<compile_context>
chip_gen: v7x
topology: tpu7x:2x2x1
jax: 0.10.0
libtpu: 0.0.40
codegen_flags: <defaults>
</compile_context>

<pallas_src>
import jax
import jax.numpy as jnp
from jax import lax
from jax.experimental import pallas as pl
from jax.experimental.pallas import tpu as pltpu

LANES = 128                      # vreg lane width
ACC_ROWS = 64                    # accumulator: (64, 128) f32 = 32 KiB, 8-way ILP
TARGET_BLOCK_BYTES = 8 << 20     # ~8 MiB of input per grid step
VMEM_LIMIT_BYTES = 40 << 20      # safe on v5e/v6e (128 MiB) and v7x (64 MiB/TC)
SMALL_ROWS = 64                  # below this, use the single-block path


def _small_sum_kernel(x_ref, o_ref):
    # Whole (tiny) array as one block; single reduce + scalar SMEM store.
    o_ref[0, 0] = jnp.sum(x_ref[...].astype(jnp.float32))


def _make_stream_kernel(br: int, rows: int, num_blocks: int, bpc: int,
                        needs_mask: bool, overshoot: bool):
    """Streaming reduction kernel closed over static tiling parameters."""
    last_blk = num_blocks - 1
    sub = br // ACC_ROWS

    def partial_reduce(v):
        # Inter-vreg VPU-only partial reduction onto the (64, 128) accumulator.
        return jnp.sum(v.reshape(sub, ACC_ROWS, LANES), axis=0)

    def kernel(x_ref, o_ref, acc_ref):
        c = pl.program_id(0)          # core split ("parallel")
        i = pl.program_id(1)          # block sweep ("arbitrary")

        @pl.when(i == 0)
        def _init():
            acc_ref[...] = jnp.zeros_like(acc_ref)

        if needs_mask or overshoot:   # static: only emitted when needed
            glb = c * bpc + i

            @pl.when(glb < last_blk)
            def _steady():            # hot path: pure vld + vadd
                acc_ref[...] += partial_reduce(x_ref[...].astype(jnp.float32))

            @pl.when(glb == last_blk)
            def _last():              # cold path: masked ragged last block
                xf = x_ref[...].astype(jnp.float32)
                if needs_mask:
                    rid = last_blk * br + lax.broadcasted_iota(
                        jnp.int32, (br, 1), 0)
                    xf = jnp.where(rid < rows, xf, 0.0)
                acc_ref[...] += partial_reduce(xf)
            # glb > last_blk (overshoot steps on the last core): skipped.
        else:
            acc_ref[...] += partial_reduce(x_ref[...].astype(jnp.float32))

        @pl.when(i == pl.num_programs(1) - 1)
        def _finalize():
            # Single cross-lane reduction + scalar store per core.
            o_ref[0, 0] = jnp.sum(acc_ref[...])

    return kernel


def curating_of_attention_loss(pattn: jax.Array,
                               block_rows: int | None = None) -> jax.Array:
    """Latt = sum(pattn), computed with a Pallas TPU reduction kernel."""
    flat = pattn.reshape(-1)
    n = flat.shape[0]
    dtype = pattn.dtype
    itemsize = jnp.dtype(dtype).itemsize

    rows = n // LANES
    main_elems = rows * LANES

    # Sub-128-element ragged tail (< one vreg row): summed outside the kernel.
    tail_sum = None
    if main_elems < n:
        tail_sum = jnp.sum(flat[main_elems:].astype(jnp.float32))

    if rows == 0:
        total = tail_sum if tail_sum is not None else jnp.float32(0.0)
        return total.astype(dtype)

    x2d = (flat if main_elems == n else flat[:main_elems]).reshape(rows, LANES)

    if rows < SMALL_ROWS:
        # Tiny input: one full-array block, one grid step.
        out = pl.pallas_call(
            _small_sum_kernel,
            out_shape=jax.ShapeDtypeStruct((1, 1), jnp.float32),
            grid=(1,),
            in_specs=[pl.BlockSpec((rows, LANES), lambda i: (0, 0))],
            out_specs=pl.BlockSpec((1, 1), lambda i: (0, 0),
                                   memory_space=pltpu.SMEM),
        )(x2d)
        total = out[0, 0]
    else:
        # Block size: byte-targeted (~8 MiB of input), multiple of ACC_ROWS
        # (which also covers the dtype sublane granularity 8/16/32), <= rows.
        if block_rows is None:
            block_rows = TARGET_BLOCK_BYTES // (LANES * itemsize)
        br = min(int(block_rows), rows)
        br = max(ACC_ROWS, (br // ACC_ROWS) * ACC_ROWS)

        num_blocks = pl.cdiv(rows, br)
        needs_mask = (rows % br) != 0

        # v7x: shard the block range across both TensorCores.  On v5e/v6e
        # (single TC) this is just a sequential outer loop of size 2.
        splits = 2 if num_blocks >= 4 else 1
        bpc = pl.cdiv(num_blocks, splits)
        overshoot = splits * bpc != num_blocks

        if overshoot:
            # Clamp so the (at most one) overshoot step's DMA stays in bounds;
            # its contribution is skipped inside the kernel.
            in_index_map = lambda c, i: (jnp.minimum(c * bpc + i,
                                                     num_blocks - 1), 0)
        else:
            in_index_map = lambda c, i: (c * bpc + i, 0)

        kernel = _make_stream_kernel(br, rows, num_blocks, bpc,
                                     needs_mask, overshoot)

        out = pl.pallas_call(
            kernel,
            out_shape=jax.ShapeDtypeStruct((splits, 1), jnp.float32),
            grid=(splits, bpc),
            in_specs=[pl.BlockSpec((br, LANES), in_index_map)],
            out_specs=pl.BlockSpec((1, 1), lambda c, i: (c, 0),
                                   memory_space=pltpu.SMEM),
            scratch_shapes=[pltpu.VMEM((ACC_ROWS, LANES), jnp.float32)],
            compiler_params=pltpu.CompilerParams(
                dimension_semantics=("parallel", "arbitrary"),
                vmem_limit_bytes=VMEM_LIMIT_BYTES,
            ),
            cost_estimate=pl.CostEstimate(
                flops=n, transcendentals=0,
                bytes_accessed=main_elems * itemsize + splits * 4),
        )(x2d)
        total = jnp.sum(out)     # add the per-core partials

    if tail_sum is not None:
        total = total + tail_sum
    return total.astype(dtype)


if __name__ == "__main__":
    key = jax.random.PRNGKey(0)

    # Primary test: attention map [batch=2, heads=4, seq=16, seq=16].
    pattn = jax.random.normal(key, (2, 4, 16, 16), dtype=jnp.float32)
    latt = jax.block_until_ready(curating_of_attention_loss(pattn))
    ref = jnp.sum(pattn)
    assert jnp.allclose(latt, ref, rtol=1e-5, atol=1e-4), (latt, ref)

    # Secondary test: exercises the streaming path (multi-block sweep, 2-way
    # core split, overshoot clamp, ragged masked last block) via a small
    # forced block size.
    key2 = jax.random.PRNGKey(1)
    big = jax.random.normal(key2, (8, 8, 65, 128), dtype=jnp.float32)
    latt2 = jax.block_until_ready(
        curating_of_attention_loss(big, block_rows=256))
    ref2 = jnp.sum(big)
    assert jnp.allclose(latt2, ref2, rtol=1e-3, atol=5e-1), (latt2, ref2)

    print("KERNEL_OK")
</pallas_src>

<mosaic_0001>
module attributes {stable_mosaic.version = 11 : i64} {
  func.func @_small_sum_kernel(%arg0: i32, %arg1: memref<16x128xf32, #tpu.memory_space<vmem>>, %arg2: memref<1x1xf32, #tpu.memory_space<smem>>) attributes {dimension_semantics = [#tpu.dimension_semantics<arbitrary>], iteration_bounds = array<i64: 1>, scalar_prefetch = 0 : i64, scratch_operands = 0 : i64, tpu.core_type = #tpu.core_type<tc>, window_params = [{pipeline_mode = #tpu.pipeline_mode<synchronous>, transform_indices = @transform_0, window_bounds = array<i64: 16, 128>}, {transform_indices = @transform_1, window_bounds = array<i64: 1, 1>}]} {
    %c0 = arith.constant 0 : index
    %c0_0 = arith.constant 0 : index
    %0 = vector.load %arg1[%c0, %c0_0] : memref<16x128xf32, #tpu.memory_space<vmem>>, vector<16x128xf32>
    %1 = vector.shape_cast %0 : vector<16x128xf32> to vector<1x16x128xf32>
    %cst = arith.constant dense<0.000000e+00> : vector<1xf32>
    %2 = vector.multi_reduction <add>, %1, %cst [1, 2] : vector<1x16x128xf32> to vector<1xf32>
    %3 = vector.shape_cast %2 : vector<1xf32> to vector<1x1x1xf32>
    %4 = vector.extract %3[0, 0, 0] : f32 from vector<1x1x1xf32>
    %c0_1 = arith.constant 0 : index
    %c0_2 = arith.constant 0 : index
    %5 = memref.load %arg2[%c0_1, %c0_2] : memref<1x1xf32, #tpu.memory_space<smem>>
    memref.store %4, %arg2[%c0_1, %c0_2] : memref<1x1xf32, #tpu.memory_space<smem>>
    return
  }
  func.func @transform_0(%arg0: i32) -> (i32, i32) {
    %c0_i32 = arith.constant 0 : i32
    %c0_i32_0 = arith.constant 0 : i32
    %c0_i32_1 = arith.constant 0 : i32
    return %c0_i32, %c0_i32_0 : i32, i32
  }
  func.func @transform_1(%arg0: i32) -> (i32, i32) {
    %c0_i32 = arith.constant 0 : i32
    %c0_i32_0 = arith.constant 0 : i32
    %c0_i32_1 = arith.constant 0 : i32
    return %c0_i32, %c0_i32_0 : i32, i32
  }
}

</mosaic_0001>

<bundles_post_ra>
// kernel: tpu_custom_call.1
= control target key start
LH: loop header
LB: loop body
LE: loop exit
PB: predicated region body
PF: predicated region fallthrough
CT: control target
= control target key end

     0   :  { %6 = vsyncpa [#allocation3], 0  ;;  %s131_s0 = inlined_call_operand.hbm [shape: f32[16,128], index: 0, kind: input, shape index: {}]   ;;  %s132_s1 = inlined_call_operand.hbm [shape: f32[1,1], index: 1, kind: output, shape index: {}]  }
   0x1   :  { %7 = vsyncpa [#allocation4], 0  ;;  %s93_s6 = smov [#allocation2]   ;;  %s57_s10 = scalar_lea.hbm %s131_s0, 256 }
   0x2   :  { %s13_s7 = sshll.u32 %s93_s6, 4  ;;  %p58_p0 = scmp.ne.s32.totalorder %s131_s0, %s57_s10  ;;  %s14_s7 = int_to_ptr.vmem [resolvable:$true] %s13_s7 }
   0x3   :  { %p61_p1 = scmp.lt.u32.totalorder %s57_s10, %s131_s0 }
   0x5   :  { %p63_p2 = pnand %p61_p1, %p58_p0 }
   0x7   :  { %66 = shalt.err (!%p63_p2)
}
   0x8   :  { %s67_s15 = scalar_lea.vmem %s14_s7, 256  ;;  %p72_p4 = scmp.lt.s32.totalorder %s14_s7, %s14_s7 }
   0x9   :  { %p68_p3 = scmp.ne.s32.totalorder %s14_s7, %s67_s15  ;;  %p73_p5 = scmp.lt.s32.totalorder %s67_s15, %s67_s15 }
   0xb   :  { %p74_p6 = por %p73_p5, %p72_p4 }
   0xd   :  { %p75_p7 = pnand %p74_p6, %p68_p3 }
   0xf   :  { %78 = shalt.err (!%p75_p7)
}
  0x10   :  { %s94_s16 = smov 128   ;;  %s95_s17 = smov 8  }
  0x11   :  { %19 = dma.hbm_to_vmem [thread:$0]  %s131_s0, 256, %s14_s7, [#allocation3], %s94_s16, %s94_s16, %s95_s17  }
  0x12   :  { %89 = dma.done.wait [#allocation3], 256  }
  0x13   :  { %90 = vsyncadd [#allocation3], 4294967040  ;;  %v23_v0 = vld [vmem:[#allocation2] sm:$0xff]  ;;  %v24_v1 = vld [vmem:[#allocation2 + $0x8] sm:$0xff]  ;;  %s79_s0 = scalar_lea.hbm %s132_s1, 16 }
  0x14   :  { %v25_v2 = vadd.f32 %v24_v1, %v23_v0  ;;  %p80_p8 = scmp.ne.s32.totalorder %s132_s1, %s79_s0  ;;  %p83_p9 = scmp.lt.u32.totalorder %s79_s0, %s132_s1 }
  0x16   :  { %26 = vadd.xlane.f32.xlu0 %v25_v2  ;;  %p85_p10 = pnand %p83_p9, %p80_p8 }
  0xa3   :  { %v27_v3 = vpop.xlane.xlu0 %26 }
  0xa4   :  { %v28_v4 = vrot.slane %v27_v3, 4 }
  0xa6   :  { %v29_v5 = vadd.f32 %v28_v4, %v27_v3 }
  0xa8   :  { %v30_v6 = vrot.slane %v29_v5, 2 }
  0xaa   :  { %v31_v7 = vadd.f32 %v30_v6, %v29_v5 }
  0xac   :  { %v32_v8 = vrot.slane %v31_v7, 1 }
  0xae   :  { %v33_v9 = vadd.f32 %v32_v8, %v31_v7 }
  0xb0   :  { %51 = vpush %v33_v9 }
  0xe1   :  { %s52_s20 = spop %51 }
  0xe2   :  { %36 = sst [smem:[#allocation5]] %s52_s20 }
  0xe3   :  { %88 = shalt.err (!%p85_p10)
}
  0xe4   :  { %s96_s27 = smov [#allocation5]  }
  0xe5   :  { %44 = dma.smem_to_hbm %s96_s27, 16, %s132_s1, [#allocation4]  }
  0xe6   :  { %91 = dma.done.wait [#allocation4], 16  }
  0xe7   :  { %92 = vsyncadd [#allocation4], 4294967280 }
  0xe8   :  { %48 = sfence }
  0xe9   :  { %49 = vsyncpa [#allocation3], 1 }
  0xea   :  { %50 = vsyncpa [#allocation4], 1 }

</bundles_post_ra>
